<compile_context>
chip_gen: v6e
topology: v6e:2x2x1
jax: 0.10.0
libtpu: 0.0.40
codegen_flags: <defaults>
</compile_context>

<pallas_src>
import functools

import jax
import jax.numpy as jnp
from jax.experimental import pallas as pl
from jax.experimental.pallas import tpu as pltpu

N_MODES = 20          # nModes from the module __init__
LANE = 128            # lane width
MIN_ROW_TILE = 8      # sublane alignment
MAX_BLOCK_ROWS = 2048 # (2048,128) f32 = 1 MiB per buffer


def _make_rational_kernel(n_pairs):
    """Kernel over one (block_rows, LANE) tile using pairwise-combined modes."""

    def kernel(a_ref, b_ref, c_ref, d_ref, x_ref, o_ref):
        # a/b/c/d_ref: (n_pairs,) f32 in SMEM (scalar reads)
        # x_ref, o_ref: (block_rows, LANE) f32 in VMEM
        absx = jnp.abs(x_ref[...])
        a2 = absx * absx                      # hoisted: one square per tile
        acc0 = jnp.zeros_like(absx)
        acc1 = jnp.zeros_like(absx)
        # n_pairs is small and static -> unrolled; each pair is one divide
        # plus a handful of VPU FMAs.  Two accumulators give the scheduler
        # independent chains to interleave with divide latency.
        for i in range(n_pairs):
            num = a_ref[i] * absx + b_ref[i]
            den = a2 + c_ref[i] * absx + d_ref[i]
            term = num / den
            if i % 2 == 0:
                acc0 = acc0 + term
            else:
                acc1 = acc1 + term
        o_ref[...] = acc0 + acc1

    return kernel


def _pair_coefficients(poles, weights):
    """Combine modes pairwise:  w1/(a+q1)+w2/(a+q2) = (A a + B)/(a^2 + C a + D)."""
    q = poles.astype(jnp.float32) ** 2
    w = weights.astype(jnp.float32)
    n = q.shape[0]
    if n % 2:
        # Pad with a zero-weight dummy mode so modes pair up evenly.
        q = jnp.concatenate([q, q[-1:] + 1.0])
        w = jnp.concatenate([w, jnp.zeros((1,), jnp.float32)])
    q1, q2 = q[0::2], q[1::2]
    w1, w2 = w[0::2], w[1::2]
    A = w1 + w2
    B = w1 * q2 + w2 * q1
    C = q1 + q2
    D = q1 * q2
    return A, B, C, D


@functools.partial(jax.jit, static_argnames=("max_block_rows",))
def rational_forward(x, poles, weights, *, max_block_rows=MAX_BLOCK_ROWS):
    """Pallas equivalent of Rational.forward(x)."""
    orig_shape = x.shape
    x = x.astype(jnp.float32)
    flat = x.reshape(-1)
    n = flat.shape[0]

    A, B, C, D = _pair_coefficients(poles, weights)
    n_pairs = int(A.shape[0])

    # Lane-dense 2-D slab.  Only pad when needed; pad with 1.0 so the mode
    # with pole==0 does not divide by zero in padded lanes.
    min_block = MIN_ROW_TILE * LANE
    pad = (-n) % min_block
    if pad:
        flat = jnp.pad(flat, (0, pad), constant_values=1.0)
    rows = flat.shape[0] // LANE              # multiple of 8
    x2d = flat.reshape(rows, LANE)

    block_rows = min(max_block_rows, rows)    # multiple of 8 by construction
    grid = (pl.cdiv(rows, block_rows),)       # ragged last block is masked

    out2d = pl.pallas_call(
        _make_rational_kernel(n_pairs),
        out_shape=jax.ShapeDtypeStruct((rows, LANE), jnp.float32),
        grid_spec=pltpu.PrefetchScalarGridSpec(
            num_scalar_prefetch=0,
            grid=grid,
            in_specs=[
                pl.BlockSpec(memory_space=pltpu.MemorySpace.SMEM),   # A
                pl.BlockSpec(memory_space=pltpu.MemorySpace.SMEM),   # B
                pl.BlockSpec(memory_space=pltpu.MemorySpace.SMEM),   # C
                pl.BlockSpec(memory_space=pltpu.MemorySpace.SMEM),   # D
                pl.BlockSpec((block_rows, LANE), lambda i: (i, 0)),  # x tile
            ],
            out_specs=pl.BlockSpec((block_rows, LANE), lambda i: (i, 0)),
        ),
        compiler_params=pltpu.CompilerParams(
            dimension_semantics=("parallel",)),
    )(A, B, C, D, x2d)

    if pad:
        return out2d.reshape(-1)[:n].reshape(orig_shape)
    return out2d.reshape(orig_shape)


def _reference(x, poles, weights):
    den = jnp.abs(x)[..., None] + poles ** 2
    return (weights / den).sum(axis=-1)


if __name__ == "__main__":
    key = jax.random.PRNGKey(0)

    # Deterministic parameter init (shapes from Rational.__init__):
    #   poles   = linspace(0, 100, nModes)
    #   weights : (nModes,) -- module inits to zeros; use a deterministic
    #             nonzero ramp so the numerical check is meaningful.
    poles = jnp.linspace(0.0, 100.0, N_MODES, dtype=jnp.float32)
    weights = jnp.linspace(-1.0, 1.0, N_MODES, dtype=jnp.float32)

    # Small example input consistent with an arbitrary-shaped x.
    x = 10.0 * jax.random.normal(key, (2, 4, 16, 16), dtype=jnp.float32)

    out = rational_forward(x, poles, weights)
    out = jax.block_until_ready(out)

    ref = _reference(x, poles, weights)
    assert out.shape == x.shape
    assert jnp.allclose(out, ref, rtol=1e-5, atol=1e-6), "mismatch vs reference"

    print("KERNEL_OK")
</pallas_src>

<mosaic_0001>
module attributes {stable_mosaic.version = 11 : i64} {
  func.func @kernel(%arg0: i32, %arg1: memref<10xf32, #tpu.memory_space<smem>>, %arg2: memref<10xf32, #tpu.memory_space<smem>>, %arg3: memref<10xf32, #tpu.memory_space<smem>>, %arg4: memref<10xf32, #tpu.memory_space<smem>>, %arg5: memref<16x128xf32, #tpu.memory_space<vmem>>, %arg6: memref<16x128xf32, #tpu.memory_space<vmem>>) attributes {dimension_semantics = [#tpu.dimension_semantics<parallel>], iteration_bounds = array<i64: 1>, scalar_prefetch = 0 : i64, scratch_operands = 0 : i64, tpu.core_type = #tpu.core_type<tc>, window_params = [{transform_indices = @transform_0, window_bounds = array<i64: 10>}, {transform_indices = @transform_1, window_bounds = array<i64: 10>}, {transform_indices = @transform_2, window_bounds = array<i64: 10>}, {transform_indices = @transform_3, window_bounds = array<i64: 10>}, {transform_indices = @transform_4, window_bounds = array<i64: 16, 128>}, {transform_indices = @transform_5, window_bounds = array<i64: 16, 128>}]} {
    %c0 = arith.constant 0 : index
    %c0_0 = arith.constant 0 : index
    %0 = vector.load %arg5[%c0, %c0_0] : memref<16x128xf32, #tpu.memory_space<vmem>>, vector<16x128xf32>
    %1 = math.absf %0 : vector<16x128xf32>
    %2 = arith.mulf %1, %1 : vector<16x128xf32>
    %cst = arith.constant 0.000000e+00 : f32
    %3 = vector.broadcast %cst : f32 to vector<16x128xf32>
    %cst_1 = arith.constant 0.000000e+00 : f32
    %4 = vector.broadcast %cst_1 : f32 to vector<16x128xf32>
    %c0_2 = arith.constant 0 : index
    %5 = memref.load %arg1[%c0_2] : memref<10xf32, #tpu.memory_space<smem>>
    %6 = vector.broadcast %5 : f32 to vector<16x128xf32>
    %7 = arith.mulf %6, %1 : vector<16x128xf32>
    %c0_3 = arith.constant 0 : index
    %8 = memref.load %arg2[%c0_3] : memref<10xf32, #tpu.memory_space<smem>>
    %9 = vector.broadcast %8 : f32 to vector<16x128xf32>
    %10 = arith.addf %7, %9 : vector<16x128xf32>
    %c0_4 = arith.constant 0 : index
    %11 = memref.load %arg3[%c0_4] : memref<10xf32, #tpu.memory_space<smem>>
    %12 = vector.broadcast %11 : f32 to vector<16x128xf32>
    %13 = arith.mulf %12, %1 : vector<16x128xf32>
    %14 = arith.addf %2, %13 : vector<16x128xf32>
    %c0_5 = arith.constant 0 : index
    %15 = memref.load %arg4[%c0_5] : memref<10xf32, #tpu.memory_space<smem>>
    %16 = vector.broadcast %15 : f32 to vector<16x128xf32>
    %17 = arith.addf %14, %16 : vector<16x128xf32>
    %18 = arith.divf %10, %17 : vector<16x128xf32>
    %19 = arith.addf %3, %18 : vector<16x128xf32>
    %c1 = arith.constant 1 : index
    %20 = memref.load %arg1[%c1] : memref<10xf32, #tpu.memory_space<smem>>
    %21 = vector.broadcast %20 : f32 to vector<16x128xf32>
    %22 = arith.mulf %21, %1 : vector<16x128xf32>
    %c1_6 = arith.constant 1 : index
    %23 = memref.load %arg2[%c1_6] : memref<10xf32, #tpu.memory_space<smem>>
    %24 = vector.broadcast %23 : f32 to vector<16x128xf32>
    %25 = arith.addf %22, %24 : vector<16x128xf32>
    %c1_7 = arith.constant 1 : index
    %26 = memref.load %arg3[%c1_7] : memref<10xf32, #tpu.memory_space<smem>>
    %27 = vector.broadcast %26 : f32 to vector<16x128xf32>
    %28 = arith.mulf %27, %1 : vector<16x128xf32>
    %29 = arith.addf %2, %28 : vector<16x128xf32>
    %c1_8 = arith.constant 1 : index
    %30 = memref.load %arg4[%c1_8] : memref<10xf32, #tpu.memory_space<smem>>
    %31 = vector.broadcast %30 : f32 to vector<16x128xf32>
    %32 = arith.addf %29, %31 : vector<16x128xf32>
    %33 = arith.divf %25, %32 : vector<16x128xf32>
    %34 = arith.addf %4, %33 : vector<16x128xf32>
    %c2 = arith.constant 2 : index
    %35 = memref.load %arg1[%c2] : memref<10xf32, #tpu.memory_space<smem>>
    %36 = vector.broadcast %35 : f32 to vector<16x128xf32>
    %37 = arith.mulf %36, %1 : vector<16x128xf32>
    %c2_9 = arith.constant 2 : index
    %38 = memref.load %arg2[%c2_9] : memref<10xf32, #tpu.memory_space<smem>>
    %39 = vector.broadcast %38 : f32 to vector<16x128xf32>
    %40 = arith.addf %37, %39 : vector<16x128xf32>
    %c2_10 = arith.constant 2 : index
    %41 = memref.load %arg3[%c2_10] : memref<10xf32, #tpu.memory_space<smem>>
    %42 = vector.broadcast %41 : f32 to vector<16x128xf32>
    %43 = arith.mulf %42, %1 : vector<16x128xf32>
    %44 = arith.addf %2, %43 : vector<16x128xf32>
    %c2_11 = arith.constant 2 : index
    %45 = memref.load %arg4[%c2_11] : memref<10xf32, #tpu.memory_space<smem>>
    %46 = vector.broadcast %45 : f32 to vector<16x128xf32>
    %47 = arith.addf %44, %46 : vector<16x128xf32>
    %48 = arith.divf %40, %47 : vector<16x128xf32>
    %49 = arith.addf %19, %48 : vector<16x128xf32>
    %c3 = arith.constant 3 : index
    %50 = memref.load %arg1[%c3] : memref<10xf32, #tpu.memory_space<smem>>
    %51 = vector.broadcast %50 : f32 to vector<16x128xf32>
    %52 = arith.mulf %51, %1 : vector<16x128xf32>
    %c3_12 = arith.constant 3 : index
    %53 = memref.load %arg2[%c3_12] : memref<10xf32, #tpu.memory_space<smem>>
    %54 = vector.broadcast %53 : f32 to vector<16x128xf32>
    %55 = arith.addf %52, %54 : vector<16x128xf32>
    %c3_13 = arith.constant 3 : index
    %56 = memref.load %arg3[%c3_13] : memref<10xf32, #tpu.memory_space<smem>>
    %57 = vector.broadcast %56 : f32 to vector<16x128xf32>
    %58 = arith.mulf %57, %1 : vector<16x128xf32>
    %59 = arith.addf %2, %58 : vector<16x128xf32>
    %c3_14 = arith.constant 3 : index
    %60 = memref.load %arg4[%c3_14] : memref<10xf32, #tpu.memory_space<smem>>
    %61 = vector.broadcast %60 : f32 to vector<16x128xf32>
    %62 = arith.addf %59, %61 : vector<16x128xf32>
    %63 = arith.divf %55, %62 : vector<16x128xf32>
    %64 = arith.addf %34, %63 : vector<16x128xf32>
    %c4 = arith.constant 4 : index
    %65 = memref.load %arg1[%c4] : memref<10xf32, #tpu.memory_space<smem>>
    %66 = vector.broadcast %65 : f32 to vector<16x128xf32>
    %67 = arith.mulf %66, %1 : vector<16x128xf32>
    %c4_15 = arith.constant 4 : index
    %68 = memref.load %arg2[%c4_15] : memref<10xf32, #tpu.memory_space<smem>>
    %69 = vector.broadcast %68 : f32 to vector<16x128xf32>
    %70 = arith.addf %67, %69 : vector<16x128xf32>
    %c4_16 = arith.constant 4 : index
    %71 = memref.load %arg3[%c4_16] : memref<10xf32, #tpu.memory_space<smem>>
    %72 = vector.broadcast %71 : f32 to vector<16x128xf32>
    %73 = arith.mulf %72, %1 : vector<16x128xf32>
    %74 = arith.addf %2, %73 : vector<16x128xf32>
    %c4_17 = arith.constant 4 : index
    %75 = memref.load %arg4[%c4_17] : memref<10xf32, #tpu.memory_space<smem>>
    %76 = vector.broadcast %75 : f32 to vector<16x128xf32>
    %77 = arith.addf %74, %76 : vector<16x128xf32>
    %78 = arith.divf %70, %77 : vector<16x128xf32>
    %79 = arith.addf %49, %78 : vector<16x128xf32>
    %c5 = arith.constant 5 : index
    %80 = memref.load %arg1[%c5] : memref<10xf32, #tpu.memory_space<smem>>
    %81 = vector.broadcast %80 : f32 to vector<16x128xf32>
    %82 = arith.mulf %81, %1 : vector<16x128xf32>
    %c5_18 = arith.constant 5 : index
    %83 = memref.load %arg2[%c5_18] : memref<10xf32, #tpu.memory_space<smem>>
    %84 = vector.broadcast %83 : f32 to vector<16x128xf32>
    %85 = arith.addf %82, %84 : vector<16x128xf32>
    %c5_19 = arith.constant 5 : index
    %86 = memref.load %arg3[%c5_19] : memref<10xf32, #tpu.memory_space<smem>>
    %87 = vector.broadcast %86 : f32 to vector<16x128xf32>
    %88 = arith.mulf %87, %1 : vector<16x128xf32>
    %89 = arith.addf %2, %88 : vector<16x128xf32>
    %c5_20 = arith.constant 5 : index
    %90 = memref.load %arg4[%c5_20] : memref<10xf32, #tpu.memory_space<smem>>
    %91 = vector.broadcast %90 : f32 to vector<16x128xf32>
    %92 = arith.addf %89, %91 : vector<16x128xf32>
    %93 = arith.divf %85, %92 : vector<16x128xf32>
    %94 = arith.addf %64, %93 : vector<16x128xf32>
    %c6 = arith.constant 6 : index
    %95 = memref.load %arg1[%c6] : memref<10xf32, #tpu.memory_space<smem>>
    %96 = vector.broadcast %95 : f32 to vector<16x128xf32>
    %97 = arith.mulf %96, %1 : vector<16x128xf32>
    %c6_21 = arith.constant 6 : index
    %98 = memref.load %arg2[%c6_21] : memref<10xf32, #tpu.memory_space<smem>>
    %99 = vector.broadcast %98 : f32 to vector<16x128xf32>
    %100 = arith.addf %97, %99 : vector<16x128xf32>
    %c6_22 = arith.constant 6 : index
    %101 = memref.load %arg3[%c6_22] : memref<10xf32, #tpu.memory_space<smem>>
    %102 = vector.broadcast %101 : f32 to vector<16x128xf32>
    %103 = arith.mulf %102, %1 : vector<16x128xf32>
    %104 = arith.addf %2, %103 : vector<16x128xf32>
    %c6_23 = arith.constant 6 : index
    %105 = memref.load %arg4[%c6_23] : memref<10xf32, #tpu.memory_space<smem>>
    %106 = vector.broadcast %105 : f32 to vector<16x128xf32>
    %107 = arith.addf %104, %106 : vector<16x128xf32>
    %108 = arith.divf %100, %107 : vector<16x128xf32>
    %109 = arith.addf %79, %108 : vector<16x128xf32>
    %c7 = arith.constant 7 : index
    %110 = memref.load %arg1[%c7] : memref<10xf32, #tpu.memory_space<smem>>
    %111 = vector.broadcast %110 : f32 to vector<16x128xf32>
    %112 = arith.mulf %111, %1 : vector<16x128xf32>
    %c7_24 = arith.constant 7 : index
    %113 = memref.load %arg2[%c7_24] : memref<10xf32, #tpu.memory_space<smem>>
    %114 = vector.broadcast %113 : f32 to vector<16x128xf32>
    %115 = arith.addf %112, %114 : vector<16x128xf32>
    %c7_25 = arith.constant 7 : index
    %116 = memref.load %arg3[%c7_25] : memref<10xf32, #tpu.memory_space<smem>>
    %117 = vector.broadcast %116 : f32 to vector<16x128xf32>
    %118 = arith.mulf %117, %1 : vector<16x128xf32>
    %119 = arith.addf %2, %118 : vector<16x128xf32>
    %c7_26 = arith.constant 7 : index
    %120 = memref.load %arg4[%c7_26] : memref<10xf32, #tpu.memory_space<smem>>
    %121 = vector.broadcast %120 : f32 to vector<16x128xf32>
    %122 = arith.addf %119, %121 : vector<16x128xf32>
    %123 = arith.divf %115, %122 : vector<16x128xf32>
    %124 = arith.addf %94, %123 : vector<16x128xf32>
    %c8 = arith.constant 8 : index
    %125 = memref.load %arg1[%c8] : memref<10xf32, #tpu.memory_space<smem>>
    %126 = vector.broadcast %125 : f32 to vector<16x128xf32>
    %127 = arith.mulf %126, %1 : vector<16x128xf32>
    %c8_27 = arith.constant 8 : index
    %128 = memref.load %arg2[%c8_27] : memref<10xf32, #tpu.memory_space<smem>>
    %129 = vector.broadcast %128 : f32 to vector<16x128xf32>
    %130 = arith.addf %127, %129 : vector<16x128xf32>
    %c8_28 = arith.constant 8 : index
    %131 = memref.load %arg3[%c8_28] : memref<10xf32, #tpu.memory_space<smem>>
    %132 = vector.broadcast %131 : f32 to vector<16x128xf32>
    %133 = arith.mulf %132, %1 : vector<16x128xf32>
    %134 = arith.addf %2, %133 : vector<16x128xf32>
    %c8_29 = arith.constant 8 : index
    %135 = memref.load %arg4[%c8_29] : memref<10xf32, #tpu.memory_space<smem>>
    %136 = vector.broadcast %135 : f32 to vector<16x128xf32>
    %137 = arith.addf %134, %136 : vector<16x128xf32>
    %138 = arith.divf %130, %137 : vector<16x128xf32>
    %139 = arith.addf %109, %138 : vector<16x128xf32>
    %c9 = arith.constant 9 : index
    %140 = memref.load %arg1[%c9] : memref<10xf32, #tpu.memory_space<smem>>
    %141 = vector.broadcast %140 : f32 to vector<16x128xf32>
    %142 = arith.mulf %141, %1 : vector<16x128xf32>
    %c9_30 = arith.constant 9 : index
    %143 = memref.load %arg2[%c9_30] : memref<10xf32, #tpu.memory_space<smem>>
    %144 = vector.broadcast %143 : f32 to vector<16x128xf32>
    %145 = arith.addf %142, %144 : vector<16x128xf32>
    %c9_31 = arith.constant 9 : index
    %146 = memref.load %arg3[%c9_31] : memref<10xf32, #tpu.memory_space<smem>>
    %147 = vector.broadcast %146 : f32 to vector<16x128xf32>
    %148 = arith.mulf %147, %1 : vector<16x128xf32>
    %149 = arith.addf %2, %148 : vector<16x128xf32>
    %c9_32 = arith.constant 9 : index
    %150 = memref.load %arg4[%c9_32] : memref<10xf32, #tpu.memory_space<smem>>
    %151 = vector.broadcast %150 : f32 to vector<16x128xf32>
    %152 = arith.addf %149, %151 : vector<16x128xf32>
    %153 = arith.divf %145, %152 : vector<16x128xf32>
    %154 = arith.addf %124, %153 : vector<16x128xf32>
    %155 = arith.addf %139, %154 : vector<16x128xf32>
    %c0_33 = arith.constant 0 : index
    %c0_34 = arith.constant 0 : index
    %156 = vector.load %arg6[%c0_33, %c0_34] : memref<16x128xf32, #tpu.memory_space<vmem>>, vector<16x128xf32>
    tpu.vector_store %arg6[%c0_33, %c0_34], %155 {strides = array<i32>} : memref<16x128xf32, #tpu.memory_space<vmem>>, vector<16x128xf32>,
    return
  }
  func.func @transform_0(%arg0: i32) -> i32 {
    %c0_i32 = arith.constant 0 : i32
    %c0_i32_0 = arith.constant 0 : i32
    return %c0_i32 : i32
  }
  func.func @transform_1(%arg0: i32) -> i32 {
    %c0_i32 = arith.constant 0 : i32
    %c0_i32_0 = arith.constant 0 : i32
    return %c0_i32 : i32
  }
  func.func @transform_2(%arg0: i32) -> i32 {
    %c0_i32 = arith.constant 0 : i32
    %c0_i32_0 = arith.constant 0 : i32
    return %c0_i32 : i32
  }
  func.func @transform_3(%arg0: i32) -> i32 {
    %c0_i32 = arith.constant 0 : i32
    %c0_i32_0 = arith.constant 0 : i32
    return %c0_i32 : i32
  }
  func.func @transform_4(%arg0: i32) -> (i32, i32) {
    %c0_i32 = arith.constant 0 : i32
    %c0_i32_0 = arith.constant 0 : i32
    return %arg0, %c0_i32 : i32, i32
  }
  func.func @transform_5(%arg0: i32) -> (i32, i32) {
    %c0_i32 = arith.constant 0 : i32
    %c0_i32_0 = arith.constant 0 : i32
    return %arg0, %c0_i32 : i32, i32
  }
}

</mosaic_0001>

<bundles_post_ra>
// kernel: integer_pow.1
= control target key start
LH: loop header
LB: loop body
LE: loop exit
PB: predicated region body
PF: predicated region fallthrough
CT: control target
= control target key end

     0   :  { %s34_s0 = inlined_call_operand.vmem [shape: f32[20], index: 0, kind: input, shape index: {}, may-alias: {0,1}]   ;;  %s35_s1 = inlined_call_operand.vmem [shape: f32[20], index: 1, kind: input, shape index: {}, may-alias: {0,1}]   ;;  %s36_s2 = inlined_call_operand.vmem [shape: f32[20], index: 2, kind: output, shape index: {}]  }
   0x1   :  { %v3_v0 = vld [vmem:[%s34_s0] sm:$0x1] }
   0x2   :  { %v4_v1 = vld [vmem:[%s35_s1] sm:$0x1] }
   0x3   :  { %v7_v2 = vmul.f32 %v4_v1, %v3_v0 }
   0x5   :  { %9 = vst [vmem:[%s36_s2] sm:$0x1] %v7_v2 }

// kernel: rational_forward.1
= control target key start
LH: loop header
LB: loop body
LE: loop exit
PB: predicated region body
PF: predicated region fallthrough
CT: control target
= control target key end

     0   :  { %10 = vsyncpa [#allocation3], 0  ;;  %s727_s0 = inlined_call_operand.vmem [shape: f32[10], index: 0, kind: input, shape index: {}]   ;;  %s728_s1 = inlined_call_operand.vmem [shape: f32[10], index: 1, kind: input, shape index: {}]   ;;  %s729_s2 = inlined_call_operand.vmem [shape: f32[10], index: 2, kind: input, shape index: {}]   ;;  %s730_s3 = inlined_call_operand.vmem [shape: f32[10], index: 3, kind: input, shape index: {}]   ;;  %s731_s4 = inlined_call_operand.vmem [shape: f32[16,128], index: 4, kind: input, shape index: {}]   ;;  %s732_s5 = inlined_call_operand.vmem [shape: f32[16,128], index: 5, kind: output, shape index: {}]  }
   0x1   :  { %11 = vsyncpa [#allocation5], 0  ;;  %s29_s20 = sshll.u32 %s728_s1, 4  ;;  %s30_s20 = int_to_ptr.vmem [resolvable:$true] %s29_s20 }
   0x2   :  { %12 = vsyncpa [#allocation8], 0  ;;  %s19_s23 = sshll.u32 %s727_s0, 4  ;;  %s405_s24 = scalar_lea.vmem %s30_s20, 16  ;;  %s20_s23 = int_to_ptr.vmem [resolvable:$true] %s19_s23 }
   0x3   :  { %p406_p0 = scmp.ne.s32.totalorder %s30_s20, %s405_s24  ;;  %p410_p1 = scmp.lt.s32.totalorder %s30_s20, %s30_s20 }
   0x4   :  { %p411_p2 = scmp.lt.s32.totalorder %s405_s24, %s405_s24 }
   0x6   :  { %p412_p3 = por %p411_p2, %p410_p1 }
   0x8   :  { %p413_p4 = pnand %p412_p3, %p406_p0 }
   0xa   :  { %416 = shalt.err (!%p413_p4)
}
   0xb   :  { %s459_s25 = smov [#allocation4]   ;;  %s417_s26 = scalar_lea.vmem %s20_s23, 16 }
   0xc   :  { %32 = dma.vmem_to_smem %s30_s20, 16, %s459_s25, [#allocation5]  }
   0xd   :  { %p418_p5 = scmp.ne.s32.totalorder %s20_s23, %s417_s26  ;;  %p422_p6 = scmp.lt.s32.totalorder %s20_s23, %s20_s23 }
   0xe   :  { %p423_p7 = scmp.lt.s32.totalorder %s417_s26, %s417_s26 }
  0x10   :  { %p424_p8 = por %p423_p7, %p422_p6 }
  0x12   :  { %p425_p9 = pnand %p424_p8, %p418_p5 }
  0x14   :  { %428 = shalt.err (!%p425_p9)
}
  0x15   :  { %s460_s1 = smov [#allocation2]   ;;  %s39_s28 = sshll.u32 %s729_s2, 4  ;;  %s40_s28 = int_to_ptr.vmem [resolvable:$true] %s39_s28 }
  0x16   :  { %22 = dma.vmem_to_smem %s20_s23, 16, %s460_s1, [#allocation3]  }
  0x17   :  { %s49_s6 = sshll.u32 %s730_s3, 4  ;;  %s429_s7 = scalar_lea.vmem %s40_s28, 16  ;;  %s50_s6 = int_to_ptr.vmem [resolvable:$true] %s49_s6 }
  0x18   :  { %p430_p10 = scmp.ne.s32.totalorder %s40_s28, %s429_s7  ;;  %p434_p11 = scmp.lt.s32.totalorder %s40_s28, %s40_s28 }
  0x19   :  { %p435_p12 = scmp.lt.s32.totalorder %s429_s7, %s429_s7 }
  0x1b   :  { %p436_p13 = por %p435_p12, %p434_p11 }
  0x1d   :  { %p437_p0 = pnand %p436_p13, %p430_p10 }
  0x1f   :  { %440 = shalt.err (!%p437_p0)
}
  0x20   :  { %s461_s8 = smov [#allocation6]   ;;  %s441_s9 = scalar_lea.vmem %s50_s6, 16 }
  0x21   :  { %42 = dma.vmem_to_smem %s40_s28, 16, %s461_s8, [#allocation5]  }
  0x22   :  { %p442_p1 = scmp.ne.s32.totalorder %s50_s6, %s441_s9  ;;  %p446_p2 = scmp.lt.s32.totalorder %s50_s6, %s50_s6 }
  0x23   :  { %p447_p3 = scmp.lt.s32.totalorder %s441_s9, %s441_s9 }
  0x25   :  { %p448_p4 = por %p447_p3, %p446_p2 }
  0x27   :  { %p449_p5 = pnand %p448_p4, %p442_p1 }
  0x29   :  { %452 = shalt.err (!%p449_p5)
}
  0x2a   :  { %s462_s2 = smov [#allocation7]  }
  0x2b   :  { %52 = dma.vmem_to_smem %s50_s6, 16, %s462_s2, [#allocation8]  }
  0x2c   :  { %453 = dma.done.wait [#allocation3], 16  }
  0x2d   :  { %454 = vsyncadd [#allocation3], 4294967280 }
  0x2e   :  { %455 = dma.done.wait [#allocation5], 32  }
  0x2f   :  { %456 = vsyncadd [#allocation5], 4294967264 }
  0x30   :  { %457 = dma.done.wait [#allocation8], 16  }
  0x31   :  { %458 = vsyncadd [#allocation8], 4294967280 }
  0x32   :  { %67 = sfence }
  0x33   :  { %s82_s3 = sld [smem:[#allocation6]]  ;;  %v68_v0 = vld [vmem:[%s731_s4] sm:$0xff]  ;;  %v69_v1 = vld [vmem:[%s731_s4 + $0x8] sm:$0xff] }
  0x34   :  { %s74_s10 = sld [smem:[#allocation2]]  ;;  %v515_v2 = vand.u32 2147483647, %v68_v0  ;;  %v519_v3 = vand.u32 2147483647, %v69_v1 }
  0x35   :  { %s508_s13 = sld [smem:[#allocation4]] }
  0x36   :  { %s513_s16 = sld [smem:[#allocation7]]  ;;  %v527_v5 = vmul.f32 %v515_v2, %v515_v2  ;;  %v532_v7 = vmul.f32 %v519_v3, %v519_v3 }
  0x37   :  { %s325_s17 = sld [smem:[#allocation2 + $0x1]] }
  0x38   :  { %s517_s18 = sld [smem:[#allocation4 + $0x1]] }
  0x39   :  { %v83_v4 = vstv %s82_s3  ;;  %s327_s19 = sld [smem:[#allocation6 + $0x1]] }
  0x3a   :  { %s521_s20 = sld [smem:[#allocation2 + $0x2]]  ;;  %v84_v6 = vmul.f32 %v83_v4, %v515_v2  ;;  %v75_v8 = vstv %s74_s10  ;;  %v85_v9 = vmul.f32 %v83_v4, %v519_v3 }
  0x3b   :  { %s523_s21 = sld [smem:[#allocation6 + $0x2]]  ;;  %v76_v11 = vmul.f32 %v75_v8, %v515_v2  ;;  %v77_v13 = vmul.f32 %v75_v8, %v519_v3  ;;  %v79_v17 = vstv %s508_s13 }
  0x3c   :  { %s535_s4 = sld [smem:[#allocation7 + $0x1]]  ;;  %v86_v12 = vadd.f32 %v84_v6, %v527_v5  ;;  %v87_v14 = vadd.f32 %v85_v9, %v532_v7  ;;  %v89_v15 = vstv %s513_s16 }
  0x3d   :  { %s537_s22 = sld [smem:[#allocation6 + $0x3]]  ;;  %v99_v10 = vstv %s325_s17  ;;  %v562_v26 = vadd.f32 %v79_v17, %v76_v11  ;;  %v564_v27 = vadd.f32 %v79_v17, %v77_v13 }
  0x3e   :  { %s539_s23 = sld [smem:[#allocation4 + $0x2]]  ;;  %v100_v18 = vmul.f32 %v99_v10, %v515_v2  ;;  %v101_v19 = vmul.f32 %v99_v10, %v519_v3  ;;  %v103_v20 = vstv %s517_s18  ;;  %v90_v23 = vadd.f32 %v89_v15, %v86_v12 }
  0x3f   :  { %s543_s24 = sld [smem:[#allocation6 + $0x4]]  ;;  %v107_v16 = vstv %s327_s19  ;;  %v91_v28 = vadd.f32 %v89_v15, %v87_v14 }
  0x40   :  { %s548_s25 = sld [smem:[#allocation2 + $0x3]]  ;;  %v123_v21 = vstv %s521_s20  ;;  %v108_v24 = vmul.f32 %v107_v16, %v515_v2  ;;  %v109_v25 = vmul.f32 %v107_v16, %v519_v3  ;;  %v568_v29 = vadd.f32 %v103_v20, %v100_v18 }
  0x41   :  { %s552_s26 = sld [smem:[#allocation7 + $0x2]]  ;;  %v131_v22 = vstv %s523_s21  ;;  %v124_v30 = vmul.f32 %v123_v21, %v515_v2  ;;  %v575_v33 = vadd.f32 %v103_v20, %v101_v19  ;;  %v125_v34 = vmul.f32 %v123_v21, %v519_v3 }
  0x42   :  { %s558_s1 = sld [smem:[#allocation6 + $0x5]]  ;;  %v132_v31 = vmul.f32 %v131_v22, %v515_v2  ;;  %v133_v36 = vmul.f32 %v131_v22, %v519_v3  ;;  %365 = vrcp.f32 %v90_v23  ;;  %v110_v37 = vadd.f32 %v108_v24, %v527_v5 }
  0x43   :  { %s566_s0 = sld [smem:[#allocation4 + $0x3]]  ;;  %v155_v32 = vstv %s537_s22  ;;  %v111_v38 = vadd.f32 %v109_v25, %v532_v7  ;;  %367 = vrcp.f32 %v91_v28  ;;  %v113_v40 = vstv %s535_s4 }
  0x44   :  { %s573_s27 = sld [smem:[#allocation7 + $0x3]]  ;;  %v127_v35 = vstv %s539_s23  ;;  %v156_v42 = vmul.f32 %v155_v32, %v515_v2  ;;  %v134_v44 = vadd.f32 %v132_v31, %v527_v5  ;;  %v157_v45 = vmul.f32 %v155_v32, %v519_v3 }
  0x45   :  { %s580_s28 = sld [smem:[#allocation6 + $0x6]]  ;;  %v179_v39 = vstv %s543_s24  ;;  %v592_v43 = vadd.f32 %v127_v35, %v124_v30  ;;  %v599_v47 = vadd.f32 %v127_v35, %v125_v34  ;;  %v135_v48 = vadd.f32 %v133_v36, %v532_v7 }
  0x46   :  { %s585_s29 = sld [smem:[#allocation7 + $0x4]]  ;;  %v147_v41 = vstv %s548_s25  ;;  %v180_v50 = vmul.f32 %v179_v39, %v515_v2  ;;  %v114_v51 = vadd.f32 %v113_v40, %v110_v37  ;;  %v115_v52 = vadd.f32 %v113_v40, %v111_v38 }
  0x47   :  { %s590_s30 = sld [smem:[#allocation2 + $0x4]]  ;;  %v137_v49 = vstv %s552_s26  ;;  %v148_v53 = vmul.f32 %v147_v41, %v515_v2  ;;  %v181_v54 = vmul.f32 %v179_v39, %v519_v3  ;;  %v158_v56 = vadd.f32 %v156_v42, %v527_v5 }
  0x48   :  { %v203_v46 = vstv %s558_s1  ;;  %s597_s6 = sld [smem:[#allocation7 + $0x5]]  ;;  %v138_v59 = vadd.f32 %v137_v49, %v134_v44  ;;  %v159_v60 = vadd.f32 %v157_v45, %v532_v7  ;;  %v139_v63 = vadd.f32 %v137_v49, %v135_v48 }
  0x49   :  { %s604_s7 = sld [smem:[#allocation7 + $0x6]]  ;;  %v151_v55 = vstv %s566_s0  ;;  %v204_v57 = vmul.f32 %v203_v46, %v515_v2  ;;  %v205_v62 = vmul.f32 %v203_v46, %v519_v3  ;;  %v149_v0 = vmul.f32 %v147_v41, %v519_v3 }
  0x4a   :  { %s608_s8 = sld [smem:[#allocation6 + $0x7]]  ;;  %v161_v61 = vstv %s573_s27  ;;  %v182_v1 = vadd.f32 %v180_v50, %v527_v5  ;;  %369 = vrcp.f32 %v114_v51  ;;  %v183_v6 = vadd.f32 %v181_v54, %v532_v7 }
  0x4b   :  { %v227_v58 = vstv %s580_s28  ;;  %s617_s9 = sld [smem:[#allocation7 + $0x7]]  ;;  %371 = vrcp.f32 %v115_v52  ;;  %v627_v10 = vadd.f32 %v151_v55, %v148_v53  ;;  %v162_v11 = vadd.f32 %v161_v61, %v158_v56 }
  0x4c   :  { %v228_v4 = vmul.f32 %v227_v58, %v515_v2  ;;  %s622_s2 = sld [smem:[#allocation4 + $0x4]]  ;;  %v185_v8 = vstv %s585_s29  ;;  %v229_v9 = vmul.f32 %v227_v58, %v519_v3  ;;  %v206_v12 = vadd.f32 %v204_v57, %v527_v5 }
  0x4d   :  { %s630_s3 = sld [smem:[#allocation6 + $0x8]]  ;;  %373 = vrcp.f32 %v138_v59  ;;  %v163_v13 = vadd.f32 %v161_v61, %v159_v60  ;;  %v207_v14 = vadd.f32 %v205_v62, %v532_v7  ;;  %v171_v16 = vstv %s590_s30 }
  0x4e   :  { %s632_s10 = sld [smem:[#allocation2 + $0x5]]  ;;  %v209_v15 = vstv %s597_s6  ;;  %375 = vrcp.f32 %v139_v63  ;;  %v186_v17 = vadd.f32 %v185_v8, %v182_v1  ;;  %v230_v18 = vadd.f32 %v228_v4, %v527_v5 }
  0x4f   :  { %s638_s11 = sld [smem:[#allocation7 + $0x8]]  ;;  %v187_v19 = vadd.f32 %v185_v8, %v183_v6  ;;  %v231_v20 = vadd.f32 %v229_v9, %v532_v7  ;;  %v233_v21 = vstv %s604_s7  ;;  %v366_v23 = vpop.eup %365  ;;  %377 = vrcp.f32 %v162_v11 }
  0x50   :  { %s640_s12 = sld [smem:[#allocation4 + $0x5]]  ;;  %v251_v22 = vstv %s608_s8  ;;  %v210_v24 = vadd.f32 %v209_v15, %v206_v12  ;;  %v368_v30 = vpop.eup %367  ;;  %379 = vrcp.f32 %v163_v13  ;;  %v172_v31 = vmul.f32 %v171_v16, %v515_v2 }
  0x51   :  { %s645_s13 = sld [smem:[#allocation2 + $0x6]]  ;;  %v252_v25 = vmul.f32 %v251_v22, %v515_v2  ;;  %v253_v28 = vmul.f32 %v251_v22, %v519_v3  ;;  %v211_v32 = vadd.f32 %v209_v15, %v207_v14  ;;  %v257_v34 = vstv %s617_s9 }
  0x52   :  { %s651_s14 = sld [smem:[#allocation6 + $0x9]]  ;;  %381 = vrcp.f32 %v186_v17  ;;  %v234_v35 = vadd.f32 %v233_v21, %v230_v18  ;;  %v173_v38 = vmul.f32 %v171_v16, %v519_v3  ;;  %v175_v39 = vstv %s622_s2 }
  0x53   :  { %v254_v36 = vadd.f32 %v252_v25, %v527_v5  ;;  %v255_v37 = vadd.f32 %v253_v28, %v532_v7  ;;  %383 = vrcp.f32 %v187_v19  ;;  %v235_v40 = vadd.f32 %v233_v21, %v231_v20  ;;  %s657_s15 = sld [smem:[#allocation7 + $0x9]] }
  0x54   :  { %v659_v41 = vadd.f32 %v151_v55, %v149_v0  ;;  %385 = vrcp.f32 %v210_v24  ;;  %s661_s16 = sld [smem:[#allocation4 + $0x6]]  ;;  %v275_v44 = vstv %s630_s3  ;;  %v195_v45 = vstv %s632_s10 }
  0x55   :  { %v258_v42 = vadd.f32 %v257_v34, %v254_v36  ;;  %387 = vrcp.f32 %v211_v32  ;;  %s665_s17 = sld [smem:[#allocation2 + $0x7]]  ;;  %v259_v46 = vadd.f32 %v257_v34, %v255_v37  ;;  %v276_v48 = vmul.f32 %v275_v44, %v515_v2 }
  0x56   :  { %v668_v49 = vadd.f32 %v175_v39, %v172_v31  ;;  %389 = vrcp.f32 %v234_v35  ;;  %s670_s18 = sld [smem:[#allocation2 + $0x8]]  ;;  %v277_v50 = vmul.f32 %v275_v44, %v519_v3  ;;  %v281_v51 = vstv %s638_s11 }
  0x57   :  { %v674_v52 = vadd.f32 %v175_v39, %v173_v38  ;;  %v199_v53 = vstv %s640_s12  ;;  %391 = vrcp.f32 %v235_v40  ;;  %v278_v54 = vadd.f32 %v276_v48, %v527_v5  ;;  %v370_v55 = vpop.eup %369  ;;  %s680_s19 = sld [smem:[#allocation4 + $0x7]] }
  0x58   :  { %v196_v56 = vmul.f32 %v195_v45, %v515_v2  ;;  %v219_v57 = vstv %s645_s13  ;;  %393 = vrcp.f32 %v258_v42  ;;  %v279_v58 = vadd.f32 %v277_v50, %v532_v7  ;;  %v372_v59 = vpop.eup %371  ;;  %s687_s20 = sld [smem:[#allocation4 + $0x8]] }
  0x59   :  { %v197_v60 = vmul.f32 %v195_v45, %v519_v3  ;;  %395 = vrcp.f32 %v259_v46  ;;  %v282_v61 = vadd.f32 %v281_v51, %v278_v54  ;;  %v299_v62 = vstv %s651_s14  ;;  %s691_s21 = sld [smem:[#allocation2 + $0x9]] }
  0x5a   :  { %v374_v63 = vpop.eup %373  ;;  %v93_v0 = vmul.f32 %v366_v23, %v562_v26  ;;  %v95_v1 = vmul.f32 %v368_v30, %v564_v27  ;;  %v283_v4 = vadd.f32 %v281_v51, %v279_v58  ;;  %v300_v6 = vmul.f32 %v299_v62, %v515_v2  ;;  %s705_s4 = sld [smem:[#allocation4 + $0x9]] }
  0x5b   :  { %v376_v8 = vpop.eup %375  ;;  %v220_v9 = vmul.f32 %v219_v57, %v515_v2  ;;  %397 = vrcp.f32 %v282_v61  ;;  %v301_v11 = vmul.f32 %v299_v62, %v519_v3  ;;  %v305_v12 = vstv %s657_s15 }
  0x5c   :  { %v200_v13 = vadd.f32 %v199_v53, %v196_v56  ;;  %v223_v26 = vstv %s661_s16  ;;  %399 = vrcp.f32 %v283_v4  ;;  %v302_v27 = vadd.f32 %v300_v6, %v527_v5  ;;  %v378_v14 = vpop.eup %377 }
  0x5d   :  { %v117_v15 = vmul.f32 %v370_v55, %v568_v29  ;;  %v201_v16 = vadd.f32 %v199_v53, %v197_v60  ;;  %v243_v17 = vstv %s665_s17  ;;  %v303_v18 = vadd.f32 %v301_v11, %v532_v7  ;;  %v380_v19 = vpop.eup %379 }
  0x5e   :  { %v141_v20 = vmul.f32 %v374_v63, %v592_v43  ;;  %v221_v21 = vmul.f32 %v219_v57, %v519_v3  ;;  %v267_v22 = vstv %s670_s18  ;;  %v306_v23 = vadd.f32 %v305_v12, %v302_v27 }
  0x5f   :  { %v382_v24 = vpop.eup %381  ;;  %v119_v25 = vmul.f32 %v372_v59, %v575_v33  ;;  %v143_v5 = vmul.f32 %v376_v8, %v599_v47  ;;  %v224_v28 = vadd.f32 %v223_v26, %v220_v9  ;;  %v307_v29 = vadd.f32 %v305_v12, %v303_v18 }
  0x60   :  { %v384_v30 = vpop.eup %383  ;;  %v165_v7 = vmul.f32 %v378_v14, %v627_v10  ;;  %v244_v31 = vmul.f32 %v243_v17, %v515_v2  ;;  %v247_v43 = vstv %s680_s19  ;;  %401 = vrcp.f32 %v306_v23 }
  0x61   :  { %v386_v32 = vpop.eup %385  ;;  %v167_v34 = vmul.f32 %v380_v19, %v659_v41  ;;  %v245_v33 = vmul.f32 %v243_v17, %v519_v3  ;;  %v268_v47 = vmul.f32 %v267_v22, %v515_v2  ;;  %403 = vrcp.f32 %v307_v29 }
  0x62   :  { %v388_v35 = vpop.eup %387  ;;  %v144_v36 = vadd.f32 %v141_v20, %v93_v0  ;;  %v189_v37 = vmul.f32 %v382_v24, %v668_v49  ;;  %v269_v38 = vmul.f32 %v267_v22, %v519_v3  ;;  %v271_v10 = vstv %s687_s20 }
  0x63   :  { %v390_v39 = vpop.eup %389  ;;  %v145_v40 = vadd.f32 %v143_v5, %v95_v1  ;;  %v191_v42 = vmul.f32 %v384_v30, %v674_v52  ;;  %v225_v44 = vadd.f32 %v223_v26, %v221_v21  ;;  %v291_v45 = vstv %s691_s21 }
  0x64   :  { %v392_v46 = vpop.eup %391  ;;  %v168_v41 = vadd.f32 %v165_v7, %v117_v15  ;;  %v213_v48 = vmul.f32 %v386_v32, %v200_v13  ;;  %v248_v50 = vadd.f32 %v247_v43, %v244_v31  ;;  %v169_v53 = vadd.f32 %v167_v34, %v119_v25 }
  0x65   :  { %v394_v51 = vpop.eup %393  ;;  %v215_v54 = vmul.f32 %v388_v35, %v201_v16  ;;  %v249_v55 = vadd.f32 %v247_v43, %v245_v33  ;;  %v272_v56 = vadd.f32 %v271_v10, %v268_v47  ;;  %v192_v57 = vadd.f32 %v189_v37, %v144_v36 }
  0x66   :  { %v396_v49 = vpop.eup %395  ;;  %v237_v58 = vmul.f32 %v390_v39, %v224_v28  ;;  %v273_v59 = vadd.f32 %v271_v10, %v269_v38  ;;  %v292_v60 = vmul.f32 %v291_v45, %v515_v2  ;;  %v193_v61 = vadd.f32 %v191_v42, %v145_v40 }
  0x67   :  { %v239_v52 = vmul.f32 %v392_v46, %v225_v44  ;;  %v293_v62 = vmul.f32 %v291_v45, %v519_v3  ;;  %v295_v63 = vstv %s705_s4  ;;  %v216_v1 = vadd.f32 %v213_v48, %v168_v41 }
  0x68   :  { %v398_v0 = vpop.eup %397  ;;  %v261_v4 = vmul.f32 %v394_v51, %v248_v50  ;;  %v217_v8 = vadd.f32 %v215_v54, %v169_v53  ;;  %v263_v9 = vmul.f32 %v396_v49, %v249_v55  ;;  %v240_v11 = vadd.f32 %v237_v58, %v192_v57 }
  0x69   :  { %v400_v6 = vpop.eup %399  ;;  %v285_v12 = vmul.f32 %v398_v0, %v272_v56  ;;  %v296_v13 = vadd.f32 %v295_v63, %v292_v60  ;;  %v241_v26 = vadd.f32 %v239_v52, %v193_v61  ;;  %v297_v14 = vadd.f32 %v295_v63, %v293_v62 }
  0x6a   :  { %v287_v27 = vmul.f32 %v400_v6, %v273_v59  ;;  %v264_v15 = vadd.f32 %v261_v4, %v216_v1  ;;  %v265_v2 = vadd.f32 %v263_v9, %v217_v8 }
  0x6b   :  { %v288_v18 = vadd.f32 %v285_v12, %v240_v11 }
  0x6c   :  { %v289_v3 = vadd.f32 %v287_v27, %v241_v26 }
  0x6d   :  { %v402_v16 = vpop.eup %401 }
  0x6e   :  { %v404_v17 = vpop.eup %403  ;;  %v309_v19 = vmul.f32 %v402_v16, %v296_v13 }
  0x6f   :  { %v311_v20 = vmul.f32 %v404_v17, %v297_v14 }
  0x70   :  { %v312_v21 = vadd.f32 %v309_v19, %v264_v15 }
  0x71   :  { %v313_v22 = vadd.f32 %v311_v20, %v265_v2 }
  0x72   :  { %v314_v23 = vadd.f32 %v312_v21, %v288_v18 }
  0x73   :  { %v315_v24 = vadd.f32 %v313_v22, %v289_v3 }
  0x74   :  { %316 = vst [vmem:[%s732_s5] sm:$0xff] %v314_v23 }
  0x75   :  { %317 = vst [vmem:[%s732_s5 + $0x8] sm:$0xff] %v315_v24 }
  0x76   :  { %322 = vsyncpa [#allocation3], 1 }
  0x77   :  { %323 = vsyncpa [#allocation5], 1 }
  0x78   :  { %324 = vsyncpa [#allocation8], 1 }

</bundles_post_ra>
